<compile_context>
chip_gen: v7x
topology: tpu7x:2x2x1
jax: 0.10.0
libtpu: 0.0.40
codegen_flags: <defaults>
</compile_context>

<pallas_src>
import jax
import jax.numpy as jnp
from jax.experimental import pallas as pl
from jax.experimental.pallas import tpu as pltpu


def _vardrop_kernel(x_ref, m_ref, o_ref):
    # (tile_t, tile_bh) * (1, tile_bh) broadcast multiply on the VPU.
    # The kernel is HBM-bound; this single VALU op per element is free filler.
    o_ref[...] = x_ref[...] * m_ref[...]


def _round_up(n, m):
    return ((n + m - 1) // m) * m


def _tpu_vmem_capacity_bytes():
    """Physical VMEM per TensorCore; conservative (v7x) fallback if unknown."""
    try:
        info = pltpu.get_tpu_info()
        cap = int(getattr(info, "vmem_capacity_bytes", 0) or 0)
        if cap > 0:
            return cap
    except Exception:
        pass
    return 64 << 20  # v7x has 64 MiB/TC; v5e/v6e have 128 MiB — safe either way


def _tpu_cores_per_chip():
    """Best-effort TensorCore-per-chip count (2 on v7x, 1 on v5e/v6e)."""
    try:
        info = pltpu.get_tpu_info()
        for name in ("num_cores", "cores_per_chip", "num_tensorcores",
                     "tensor_cores_per_chip"):
            v = getattr(info, name, None)
            if v:
                return int(v)
    except Exception:
        pass
    return 1


def _pick_tiles(Tp, BHp, itemsize, sub, budget_bytes):
    """Pick (tile_t, tile_bh). Tp % sub == 0 and BHp % 128 == 0 are guaranteed.

    The budget is enforced on the FULL block (tile_t * tile_bh * itemsize);
    tile_bh is validated against the minimal sublane count `sub`, fixing the
    old bug where a single-row check let blocks grow to 8x the budget.
    """
    # Prefer full-width blocks: mask stays resident for the whole kernel and
    # every DMA row is maximally lane-dense / contiguous.
    if sub * BHp * itemsize <= budget_bytes:
        tile_bh = BHp
    else:
        tile_bh = 128
        d = 128
        while d <= BHp:
            if BHp % d == 0 and sub * d * itemsize <= budget_bytes:
                tile_bh = d
            d += 128
    # Largest multiple-of-`sub` divisor of Tp such that the block fits budget.
    tile_t = sub
    d = sub
    while d <= Tp:
        if Tp % d == 0 and d * tile_bh * itemsize <= budget_bytes:
            tile_t = d
        d += sub
    return tile_t, tile_bh


def variational_dropout(x, p=0.5, *, seed=0, key=None, training=True,
                        block_budget_bytes=None):
    """Apply variational dropout to x of shape (T, B, H) = (seq_len, batch, hidden)."""
    if (not training) or p == 0.0:
        return x
    T, B, H = x.shape
    keep_prob = 1.0 - p
    if key is None:
        key = jax.random.PRNGKey(seed)

    # Single (B, H) mask, scaled by 1/keep_prob — reused for every seq position.
    # Scale computed in f32; final cast to x.dtype quantizes 1/(1-p) by at most
    # ~0.4% for bf16 (acceptable for dropout).
    mask = (jax.random.bernoulli(key, keep_prob, (B, H)).astype(jnp.float32)
            * jnp.float32(1.0 / keep_prob)).astype(x.dtype)

    itemsize = jnp.dtype(x.dtype).itemsize
    sub = max(8, 32 // itemsize)          # packed sublane tile: 8/16/32 rows
    BH = B * H

    x2 = x.reshape(T, BH)                 # lane-dense last dim
    mask2 = mask.reshape(1, BH)

    # Pad to (sublane, lane) alignment: unmasked full-lane stores and bounded
    # per-block VMEM even for odd batch/hidden sizes.
    Tp = _round_up(T, sub)
    BHp = _round_up(BH, 128)
    padded = (Tp, BHp) != (T, BH)
    if padded:
        x2 = jnp.pad(x2, ((0, Tp - T), (0, BHp - BH)))
        mask2 = jnp.pad(mask2, ((0, 0), (0, BHp - BH)))

    # Generation-aware VMEM budgeting.
    cap = _tpu_vmem_capacity_bytes()
    vmem_limit = min((cap * 3) // 4, cap - (8 << 20))   # ~96 MiB v5e/v6e, ~48 MiB v7x
    if block_budget_bytes is None:
        # 2 in + 2 out double-buffered blocks (+ mask + headroom) must fit.
        block_budget_bytes = max((vmem_limit - (4 << 20)) // 5, 1 << 20)

    tile_t, tile_bh = _pick_tiles(Tp, BHp, itemsize, sub, int(block_budget_bytes))

    block_bytes = tile_t * tile_bh * itemsize
    mask_bytes = tile_bh * itemsize
    vmem_needed = 4 * block_bytes + 2 * mask_bytes + (4 << 20)
    vmem_limit = int(min(max(vmem_limit, vmem_needed), cap - (4 << 20)))

    if tile_bh == BHp:
        # Full-width blocks: single grid axis over T; mask block index is
        # constant -> DMA'd once for the whole kernel.
        grid = (Tp // tile_t,)
        in_specs = [
            pl.BlockSpec((tile_t, tile_bh), lambda i: (i, 0)),
            pl.BlockSpec((1, tile_bh), lambda i: (0, 0)),
        ]
        out_specs = pl.BlockSpec((tile_t, tile_bh), lambda i: (i, 0))
        dim_sem = ("parallel",)
    else:
        # BH-blocks outer, T-blocks inner: the mask block index depends only
        # on the outer axis, so it is NOT re-DMA'd every inner grid step.
        grid = (BHp // tile_bh, Tp // tile_t)
        in_specs = [
            pl.BlockSpec((tile_t, tile_bh), lambda j, i: (i, j)),
            pl.BlockSpec((1, tile_bh), lambda j, i: (0, j)),
        ]
        out_specs = pl.BlockSpec((tile_t, tile_bh), lambda j, i: (i, j))
        outer_sem = "parallel"
        core_parallel = getattr(pltpu, "CORE_PARALLEL", None)
        if core_parallel is not None and _tpu_cores_per_chip() > 1:
            outer_sem = core_parallel   # v7x: split column blocks across 2 TCs
        dim_sem = (outer_sem, "arbitrary")

    out2 = pl.pallas_call(
        _vardrop_kernel,
        out_shape=jax.ShapeDtypeStruct((Tp, BHp), x.dtype),
        grid=grid,
        in_specs=in_specs,
        out_specs=out_specs,
        compiler_params=pltpu.CompilerParams(
            dimension_semantics=dim_sem,
            vmem_limit_bytes=vmem_limit,
        ),
        cost_estimate=pl.CostEstimate(
            flops=Tp * BHp,
            transcendentals=0,
            bytes_accessed=2 * Tp * BHp * itemsize + BHp * itemsize,
        ),
    )(x2, mask2)

    if padded:
        out2 = out2[:T, :BH]
    return out2.reshape(T, B, H)


if __name__ == "__main__":
    key = jax.random.PRNGKey(0)
    T, B, H = 8, 4, 32          # seq_len, batch, hidden
    x = jax.random.normal(key, (T, B, H), dtype=jnp.float32)

    p = 0.5
    y = variational_dropout(x, p=p, seed=1234, training=True)
    y = jax.block_until_ready(y)

    # --- correctness checks ---
    # 1) Mask is consistent along the seq_len dim: ratio y/x is identical for
    #    every t.
    ratio = y / x
    assert bool(jnp.allclose(ratio, ratio[0:1], atol=1e-5)), "mask not seq-consistent"
    # 2) Mask values are either 0 or 1/(1-p).
    vals = ratio[0]
    ok = jnp.logical_or(jnp.isclose(vals, 0.0, atol=1e-5),
                        jnp.isclose(vals, 1.0 / (1.0 - p), atol=1e-4))
    assert bool(jnp.all(ok)), "mask values are not in {0, 1/(1-p)}"
    # 3) eval mode / p == 0 -> identity.
    y_eval = variational_dropout(x, p=p, training=False)
    assert bool(jnp.array_equal(y_eval, x))
    y_p0 = variational_dropout(x, p=0.0, training=True)
    assert bool(jnp.array_equal(y_p0, x))
    # 4) Odd (non-128-multiple) width exercises the padding path.
    x_odd = jax.random.normal(key, (5, 3, 30), dtype=jnp.float32)
    y_odd = jax.block_until_ready(variational_dropout(x_odd, p=p, seed=7))
    r_odd = y_odd / x_odd
    assert bool(jnp.allclose(r_odd, r_odd[0:1], atol=1e-5)), "odd-shape mask not seq-consistent"

    print("KERNEL_OK")
</pallas_src>

<mosaic_0001>
module attributes {stable_mosaic.version = 11 : i64} {
  func.func @_vardrop_kernel(%arg0: i32, %arg1: memref<8x128xf32, #tpu.memory_space<vmem>>, %arg2: memref<1x128xf32, #tpu.memory_space<vmem>>, %arg3: memref<8x128xf32, #tpu.memory_space<vmem>>) attributes {dimension_semantics = [#tpu.dimension_semantics<parallel>], iteration_bounds = array<i64: 1>, scalar_prefetch = 0 : i64, scratch_operands = 0 : i64, tpu.core_type = #tpu.core_type<tc>, window_params = [{transform_indices = @transform_0, window_bounds = array<i64: 8, 128>}, {pipeline_mode = #tpu.pipeline_mode<synchronous>, transform_indices = @transform_1, window_bounds = array<i64: 1, 128>}, {transform_indices = @transform_2, window_bounds = array<i64: 8, 128>}]} {
    %c0 = arith.constant 0 : index
    %c0_0 = arith.constant 0 : index
    %0 = vector.load %arg1[%c0, %c0_0] : memref<8x128xf32, #tpu.memory_space<vmem>>, vector<8x128xf32>
    %c0_1 = arith.constant 0 : index
    %c0_2 = arith.constant 0 : index
    %1 = vector.load %arg2[%c0_1, %c0_2] : memref<1x128xf32, #tpu.memory_space<vmem>>, vector<1x128xf32>
    %2 = vector.broadcast %1 : vector<1x128xf32> to vector<8x128xf32>
    %3 = arith.mulf %0, %2 : vector<8x128xf32>
    %c0_3 = arith.constant 0 : index
    %c0_4 = arith.constant 0 : index
    %4 = vector.load %arg3[%c0_3, %c0_4] : memref<8x128xf32, #tpu.memory_space<vmem>>, vector<8x128xf32>
    tpu.vector_store %arg3[%c0_3, %c0_4], %3 {strides = array<i32>} : memref<8x128xf32, #tpu.memory_space<vmem>>, vector<8x128xf32>,
    return
  }
  func.func @transform_0(%arg0: i32) -> (i32, i32) {
    %c0_i32 = arith.constant 0 : i32
    %c0_i32_0 = arith.constant 0 : i32
    return %arg0, %c0_i32 : i32, i32
  }
  func.func @transform_1(%arg0: i32) -> (i32, i32) {
    %c0_i32 = arith.constant 0 : i32
    %c0_i32_0 = arith.constant 0 : i32
    %c0_i32_1 = arith.constant 0 : i32
    return %c0_i32, %c0_i32_0 : i32, i32
  }
  func.func @transform_2(%arg0: i32) -> (i32, i32) {
    %c0_i32 = arith.constant 0 : i32
    %c0_i32_0 = arith.constant 0 : i32
    return %arg0, %c0_i32 : i32, i32
  }
}

</mosaic_0001>

<bundles_post_ra>
// kernel: tpu_custom_call.1
= control target key start
LH: loop header
LB: loop body
LE: loop exit
PB: predicated region body
PF: predicated region fallthrough
CT: control target
= control target key end

     0   :  { %7 = vsyncpa [#allocation3], 0  ;;  %s144_s0 = inlined_call_operand.hbm [shape: f32[8,128], index: 0, kind: input, shape index: {}]   ;;  %s145_s1 = inlined_call_operand.vmem [shape: f32[1,128], index: 1, kind: input, shape index: {}]   ;;  %s146_s2 = inlined_call_operand.hbm [shape: f32[8,128], index: 2, kind: output, shape index: {}]  }
   0x1   :  { %8 = vsyncpa [#allocation4], 0  ;;  %s100_s9 = smov [#allocation2]   ;;  %s52_s13 = scalar_lea.hbm %s144_s0, 128 }
   0x2   :  { %s15_s10 = sshll.u32 %s100_s9, 4  ;;  %p53_p0 = scmp.ne.s32.totalorder %s144_s0, %s52_s13  ;;  %s16_s10 = int_to_ptr.vmem [resolvable:$true] %s15_s10 }
   0x3   :  { %p56_p1 = scmp.lt.u32.totalorder %s52_s13, %s144_s0 }
   0x5   :  { %p58_p2 = pnand %p56_p1, %p53_p0 }
   0x7   :  { %61 = shalt.err (!%p58_p2)
}
   0x8   :  { %s62_s18 = scalar_lea.vmem %s16_s10, 128  ;;  %p67_p4 = scmp.lt.s32.totalorder %s16_s10, %s16_s10 }
   0x9   :  { %p63_p3 = scmp.ne.s32.totalorder %s16_s10, %s62_s18  ;;  %p68_p5 = scmp.lt.s32.totalorder %s62_s18, %s62_s18 }
   0xb   :  { %p69_p6 = por %p68_p5, %p67_p4 }
   0xd   :  { %p70_p7 = pnand %p69_p6, %p63_p3 }
   0xf   :  { %73 = shalt.err (!%p70_p7)
}
  0x10   :  { %18 = dma.hbm_to_vmem [thread:$0]  %s144_s0, 128, %s16_s10, [#allocation3]  }
  0x11   :  { %96 = dma.done.wait [#allocation3], 128  }
  0x12   :  { %97 = vsyncadd [#allocation3], 4294967168  ;;  %s101_s21 = smov [#allocation5]   ;;  %v24_v0 = vld [vmem:[#allocation2] sm:$0xff] }
  0x13   :  { %s40_s22 = sshll.u32 %s101_s21, 4  ;;  %v49_v1 = vld [vmem:[%s145_s1] ss:$0 sm:$0xff]  ;;  %s41_s22 = int_to_ptr.vmem [resolvable:$true] %s40_s22 }
  0x14   :  { %v32_v2 = vmul.f32 %v49_v1, %v24_v0  ;;  %s74_s25 = scalar_lea.vmem %s41_s22, 128  ;;  %p79_p9 = scmp.lt.s32.totalorder %s41_s22, %s41_s22 }
  0x15   :  { %p75_p8 = scmp.ne.s32.totalorder %s41_s22, %s74_s25  ;;  %p80_p10 = scmp.lt.s32.totalorder %s74_s25, %s74_s25 }
  0x16   :  { %33 = vst [vmem:[#allocation5] sm:$0xff] %v32_v2 }
  0x17   :  { %p81_p11 = por %p80_p10, %p79_p9 }
  0x19   :  { %p82_p12 = pnand %p81_p11, %p75_p8 }
  0x1b   :  { %85 = shalt.err (!%p82_p12)
}
  0x1c   :  { %s86_s27 = scalar_lea.hbm %s146_s2, 128 }
  0x1d   :  { %p87_p13 = scmp.ne.s32.totalorder %s146_s2, %s86_s27  ;;  %p90_p0 = scmp.lt.u32.totalorder %s86_s27, %s146_s2 }
  0x1f   :  { %p92_p1 = pnand %p90_p0, %p87_p13 }
  0x21   :  { %95 = shalt.err (!%p92_p1)
}
  0x22   :  { %43 = dma.vmem_to_hbm [thread:$0]  %s41_s22, 128, %s146_s2, [#allocation4]  }
  0x23   :  { %98 = dma.done.wait [#allocation4], 128  }
  0x24   :  { %99 = vsyncadd [#allocation4], 4294967168 }
  0x25   :  { %47 = vsyncpa [#allocation3], 1 }
  0x26   :  { %48 = vsyncpa [#allocation4], 1 }

</bundles_post_ra>
